<compile_context>
chip_gen: v5e
topology: v5e:2x2
jax: 0.10.0
libtpu: 0.0.40
codegen_flags: <defaults>
</compile_context>

<pallas_src>
import jax
import jax.numpy as jnp
from jax import lax
from jax.experimental import pallas as pl
from jax.experimental.pallas import tpu as pltpu

IN_F = 10
HID_F = 20
OUT_F = 1  # kernel's VPU second layer assumes OUT_F == 1 (matches the module)


def tiny_mlp_kernel(x_ref, w1_ref, b1_ref, w2_ref, b2_ref, oT_ref):
    # fc1 on the MXU: h^T[h, b] = sum_f w1[h, f] * x[b, f]
    # (contract the feature axis of both operands -> trans-b contraction, same pattern
    #  as flash-attention's q @ k^T; no materialized transpose of the batch tile).
    h = lax.dot_general(
        w1_ref[...], x_ref[...],
        dimension_numbers=(((1,), (1,)), ((), ())),
        preferred_element_type=jnp.float32,
    )                                                   # [HID_F, TILE_B]
    # bias + ReLU on the VPU (b1 is [HID_F, 1], broadcasts across the lane/batch axis).
    h = jnp.maximum(h + b1_ref[...], 0.0)
    # fc2 on the VPU/XLU: y[b] = sum_h w2[h] * h[h, b] + b2 -> [1, TILE_B], lane-dense.
    y = jnp.sum(h * w2_ref[...], axis=0, keepdims=True) + b2_ref[...]
    oT_ref[...] = y.astype(oT_ref.dtype)


def _round_up(n, m):
    return (n + m - 1) // m * m


def tiny_mlp(x, w1, b1, w2, b2, *, tile_b=16384):
    """x: [B, IN_F]; w1: [HID_F, IN_F]; b1: [HID_F]; w2: [OUT_F, HID_F]; b2: [OUT_F]."""
    B = x.shape[0]

    # Lane-multiple tile; keep >= 2 grid steps when B allows (v7x megacore sharding)
    # and cap at 16K rows: the natural-layout x block pads 10 -> 128 lanes in VMEM
    # (~8 MiB/buffer at 16K), which stays within v7x's 64 MiB VMEM and under the
    # raised scoped limit below on v5e/v6e.
    tile_b = min(tile_b, _round_up(pl.cdiv(B, 2), 128))
    tile_b = max(128, _round_up(tile_b, 128))
    grid = (pl.cdiv(B, tile_b),)   # ragged trailing block handled by Pallas (no jnp.pad)

    # Tiny wrapper-side reshapes of the weights only (negligible traffic).
    b1_col = b1.reshape(HID_F, 1)              # [HID_F, 1]
    w2_col = w2.reshape(OUT_F, HID_F).T        # [HID_F, OUT_F] == [HID_F, 1]
    b2_col = b2.reshape(OUT_F, 1)              # [1, 1]

    yT = pl.pallas_call(
        tiny_mlp_kernel,
        out_shape=jax.ShapeDtypeStruct((OUT_F, B), x.dtype),
        grid=grid,
        in_specs=[
            pl.BlockSpec((tile_b, IN_F), lambda i: (i, 0)),   # x batch tile, natural layout
            pl.BlockSpec((HID_F, IN_F), lambda i: (0, 0)),    # W1 (VMEM-resident)
            pl.BlockSpec((HID_F, 1), lambda i: (0, 0)),       # b1 (resident)
            pl.BlockSpec((HID_F, 1), lambda i: (0, 0)),       # w2 column (resident)
            pl.BlockSpec((1, 1), lambda i: (0, 0)),           # b2 (resident)
        ],
        out_specs=pl.BlockSpec((OUT_F, tile_b), lambda i: (0, i)),  # lane-dense y^T
        compiler_params=pltpu.CompilerParams(
            dimension_semantics=("parallel",),
            vmem_limit_bytes=40 * 1024 * 1024,  # clears v5e's 16 MiB default; < v7x's 64 MiB
        ),
    )(x, w1, b1_col, w2_col, b2_col)

    return yT.T                                # [B, OUT_F]; free reshape of a [1, B] array


def init_params(key):
    # Deterministic, PyTorch-Linear-style uniform init: U(-1/sqrt(fan_in), 1/sqrt(fan_in)),
    # stored in PyTorch convention (weight: [out_features, in_features]).
    k1, k2, k3, k4 = jax.random.split(key, 4)
    bound1 = 1.0 / (IN_F ** 0.5)
    bound2 = 1.0 / (HID_F ** 0.5)
    w1 = jax.random.uniform(k1, (HID_F, IN_F), jnp.float32, -bound1, bound1)
    b1 = jax.random.uniform(k2, (HID_F,), jnp.float32, -bound1, bound1)
    w2 = jax.random.uniform(k3, (OUT_F, HID_F), jnp.float32, -bound2, bound2)
    b2 = jax.random.uniform(k4, (OUT_F,), jnp.float32, -bound2, bound2)
    return w1, b1, w2, b2


if __name__ == "__main__":
    key = jax.random.PRNGKey(0)
    kx, kp = jax.random.split(key)
    B = 8
    x = jax.random.normal(kx, (B, IN_F), jnp.float32)
    w1, b1, w2, b2 = init_params(kp)

    out = tiny_mlp(x, w1, b1, w2, b2)
    jax.block_until_ready(out)

    # Reference (same semantics as the PyTorch forward with PyTorch weight layout).
    ref = jnp.maximum(x @ w1.T + b1, 0.0) @ w2.T + b2
    assert out.shape == (B, OUT_F)
    assert jnp.allclose(out, ref, atol=1e-5, rtol=1e-5)

    print("KERNEL_OK")
</pallas_src>

<mosaic_0001>
module attributes {stable_mosaic.version = 11 : i64} {
  func.func @tiny_mlp_kernel(%arg0: i32, %arg1: memref<128x10xf32, #tpu.memory_space<vmem>>, %arg2: memref<20x10xf32, #tpu.memory_space<vmem>>, %arg3: memref<20x1xf32, #tpu.memory_space<vmem>>, %arg4: memref<20x1xf32, #tpu.memory_space<vmem>>, %arg5: memref<1x1xf32, #tpu.memory_space<vmem>>, %arg6: memref<1x128xf32, #tpu.memory_space<vmem>>) attributes {dimension_semantics = [#tpu.dimension_semantics<parallel>], iteration_bounds = array<i64: 1>, scalar_prefetch = 0 : i64, scratch_operands = 0 : i64, tpu.core_type = #tpu.core_type<tc>, window_params = [{transform_indices = @transform_0, window_bounds = array<i64: 128, 10>}, {pipeline_mode = #tpu.pipeline_mode<synchronous>, transform_indices = @transform_1, window_bounds = array<i64: 20, 10>}, {pipeline_mode = #tpu.pipeline_mode<synchronous>, transform_indices = @transform_2, window_bounds = array<i64: 20, 1>}, {pipeline_mode = #tpu.pipeline_mode<synchronous>, transform_indices = @transform_3, window_bounds = array<i64: 20, 1>}, {pipeline_mode = #tpu.pipeline_mode<synchronous>, transform_indices = @transform_4, window_bounds = array<i64: 1, 1>}, {transform_indices = @transform_5, window_bounds = array<i64: 1, 128>}]} {
    %c0 = arith.constant 0 : index
    %c0_0 = arith.constant 0 : index
    %0 = vector.load %arg2[%c0, %c0_0] : memref<20x10xf32, #tpu.memory_space<vmem>>, vector<20x10xf32>
    %c0_1 = arith.constant 0 : index
    %c0_2 = arith.constant 0 : index
    %1 = vector.load %arg1[%c0_1, %c0_2] : memref<128x10xf32, #tpu.memory_space<vmem>>, vector<128x10xf32>
    %cst = arith.constant dense<0.000000e+00> : vector<20x128xf32>
    %2 = tpu.matmul %0, %1, %cst {dimension_numbers = #tpu.dot_dimension_numbers<[1], [1], [0], [0], [0, 0, 1, 0], [], []>} : vector<20x10xf32>, vector<128x10xf32>, vector<20x128xf32> -> vector<20x128xf32>
    %c0_3 = arith.constant 0 : index
    %c0_4 = arith.constant 0 : index
    %3 = vector.load %arg3[%c0_3, %c0_4] : memref<20x1xf32, #tpu.memory_space<vmem>>, vector<20x1xf32>
    %4 = vector.broadcast %3 : vector<20x1xf32> to vector<20x128xf32>
    %5 = arith.addf %2, %4 : vector<20x128xf32>
    %cst_5 = arith.constant 0.000000e+00 : f32
    %6 = vector.broadcast %cst_5 : f32 to vector<20x128xf32>
    %7 = arith.maximumf %5, %6 : vector<20x128xf32>
    %c0_6 = arith.constant 0 : index
    %c0_7 = arith.constant 0 : index
    %8 = vector.load %arg4[%c0_6, %c0_7] : memref<20x1xf32, #tpu.memory_space<vmem>>, vector<20x1xf32>
    %9 = vector.broadcast %8 : vector<20x1xf32> to vector<20x128xf32>
    %10 = arith.mulf %7, %9 : vector<20x128xf32>
    %cst_8 = arith.constant dense<0.000000e+00> : vector<128xf32>
    %11 = vector.multi_reduction <add>, %10, %cst_8 [0] : vector<20x128xf32> to vector<128xf32>
    %12 = vector.shape_cast %11 : vector<128xf32> to vector<1x128xf32>
    %c0_9 = arith.constant 0 : index
    %c0_10 = arith.constant 0 : index
    %13 = vector.load %arg5[%c0_9, %c0_10] : memref<1x1xf32, #tpu.memory_space<vmem>>, vector<1x1xf32>
    %14 = vector.broadcast %13 : vector<1x1xf32> to vector<1x128xf32>
    %15 = arith.addf %12, %14 : vector<1x128xf32>
    %c0_11 = arith.constant 0 : index
    %c0_12 = arith.constant 0 : index
    %16 = vector.load %arg6[%c0_11, %c0_12] : memref<1x128xf32, #tpu.memory_space<vmem>>, vector<1x128xf32>
    tpu.vector_store %arg6[%c0_11, %c0_12], %15 {strides = array<i32>} : memref<1x128xf32, #tpu.memory_space<vmem>>, vector<1x128xf32>,
    return
  }
  func.func @transform_0(%arg0: i32) -> (i32, i32) {
    %c0_i32 = arith.constant 0 : i32
    %c0_i32_0 = arith.constant 0 : i32
    return %arg0, %c0_i32 : i32, i32
  }
  func.func @transform_1(%arg0: i32) -> (i32, i32) {
    %c0_i32 = arith.constant 0 : i32
    %c0_i32_0 = arith.constant 0 : i32
    %c0_i32_1 = arith.constant 0 : i32
    return %c0_i32, %c0_i32_0 : i32, i32
  }
  func.func @transform_2(%arg0: i32) -> (i32, i32) {
    %c0_i32 = arith.constant 0 : i32
    %c0_i32_0 = arith.constant 0 : i32
    %c0_i32_1 = arith.constant 0 : i32
    return %c0_i32, %c0_i32_0 : i32, i32
  }
  func.func @transform_3(%arg0: i32) -> (i32, i32) {
    %c0_i32 = arith.constant 0 : i32
    %c0_i32_0 = arith.constant 0 : i32
    %c0_i32_1 = arith.constant 0 : i32
    return %c0_i32, %c0_i32_0 : i32, i32
  }
  func.func @transform_4(%arg0: i32) -> (i32, i32) {
    %c0_i32 = arith.constant 0 : i32
    %c0_i32_0 = arith.constant 0 : i32
    %c0_i32_1 = arith.constant 0 : i32
    return %c0_i32, %c0_i32_0 : i32, i32
  }
  func.func @transform_5(%arg0: i32) -> (i32, i32) {
    %c0_i32 = arith.constant 0 : i32
    %c0_i32_0 = arith.constant 0 : i32
    return %c0_i32, %arg0 : i32, i32
  }
}

</mosaic_0001>

<bundles_post_ra>
// kernel: tpu_custom_call.1
= control target key start
LH: loop header
LB: loop body
LE: loop exit
PB: predicated region body
PF: predicated region fallthrough
CT: control target
= control target key end

     0   :  { %s449_s0 = inlined_call_operand.vmem [shape: f32[8,10], index: 0, kind: input, shape index: {}]   ;;  %s450_s1 = inlined_call_operand.vmem [shape: f32[20,10], index: 1, kind: input, shape index: {}]   ;;  %s451_s2 = inlined_call_operand.vmem [shape: f32[20,1], index: 2, kind: input, shape index: {}]   ;;  %s452_s3 = inlined_call_operand.vmem [shape: f32[20,1], index: 3, kind: input, shape index: {}]   ;;  %s453_s4 = inlined_call_operand.<no memory space> [shape: f32[1,1], index: 4, kind: input, shape index: {}]   ;;  %s454_s5 = inlined_call_operand.hbm [shape: f32[1,8], index: 5, kind: output, shape index: {}]  }
   0x1   :  { %v10_v0 = vstv %s453_s4 }
   0x2   :  { %11 = vst [vmem:[#allocation2] sm:$0x1] %v10_v0 }
   0x3   :  { %v41_v1 = vld [vmem:[%s449_s0 + $0x78] sm:$0xff]  ;;  %vm60_vm0 = vcmask 80896   ;;  %v40_v2 = vld [vmem:[%s449_s0 + $0x70] sm:$0xff] }
   0x4   :  { %203 = vmatpush.xpose.msk.msra.mxu0 %vm60_vm0, %v41_v1  ;;  %222 = vmatpush.xpose.msk.msra.mxu1 %vm60_vm0, %v41_v1 }
   0x5   :  { %223 = vmatpush.xpose.msk.msra.mxu2 %vm60_vm0, %v41_v1 }
   0x6   :  { %12 = vsyncpa [#allocation4], 0  ;;  %v39_v3 = vld [vmem:[%s449_s0 + $0x68] sm:$0xff]  ;;  %v38_v4 = vld [vmem:[%s449_s0 + $0x60] sm:$0xff]  ;;  %v285_v9 = vmov 0   ;;  %vm169_vm1 = vcmask 1043456  }
   0x7   :  { %v37_v5 = vld [vmem:[%s449_s0 + $0x58] sm:$0xff]  ;;  %v36_v6 = vld [vmem:[%s449_s0 + $0x50] sm:$0xff]  ;;  %v35_v7 = vld [vmem:[%s449_s0 + $0x48] sm:$0xff]  ;;  %256 = vset.pattern.permute.xlu0 %v285_v9  ;;  %257 = vset.pattern.permute.xlu1 %v285_v9  ;;  %s194_s18 = sshll.u32 %s454_s5, 4  ;;  %s195_s18 = int_to_ptr.hbm [resolvable:$true] %s194_s18 }
   0x8   :  { %204 = vmatpush.xpose.msk.msra.mxu0 %vm60_vm0, %v40_v2  ;;  %224 = vmatpush.xpose.msk.msra.mxu1 %vm60_vm0, %v40_v2  ;;  %v42_v8 = vld [vmem:[%s451_s2] sm:$0xff]  ;;  %v33_v11 = vld [vmem:[%s449_s0 + $0x38] sm:$0xff]  ;;  %v43_v12 = vld [vmem:[%s451_s2 + $0x8] sm:$0xff] }
   0x9   :  { %225 = vmatpush.xpose.msk.msra.mxu2 %vm60_vm0, %v40_v2  ;;  %47 = vperm.xlu0 %256, %v42_v8   ;;  %v34_v10 = vld [vmem:[%s449_s0 + $0x40] sm:$0xff]  ;;  %v44_v13 = vld [vmem:[%s451_s2 + $0x10] sm:$0xf]  ;;  %v148_v15 = vld [vmem:[%s452_s3 + $0x8] sm:$0xff] }
   0xa   :  { %258 = vset.pattern.permute.xlu2 %v285_v9  ;;  %v32_v14 = vld [vmem:[%s449_s0 + $0x30] sm:$0xff]  ;;  %57 = vperm.xlu1 %257, %v44_v13   ;;  %v178_v16 = vld [vmem:[#allocation2] sm:$0x1]  ;;  %v31_v17 = vld [vmem:[%s449_s0 + $0x28] sm:$0xff] }
   0xb   :  { %157 = vperm.xlu2 %258, %v148_v15   ;;  %v147_v18 = vld [vmem:[%s452_s3] sm:$0xff]  ;;  %v149_v19 = vld [vmem:[%s452_s3 + $0x10] sm:$0xf]  ;;  %v29_v21 = vld [vmem:[%s449_s0 + $0x18] sm:$0xff] }
   0xc   :  { %205 = vmatpush.xpose.msk.msra.mxu0 %vm60_vm0, %v39_v3  ;;  %226 = vmatpush.xpose.msk.msra.mxu1 %vm60_vm0, %v39_v3  ;;  %v30_v20 = vld [vmem:[%s449_s0 + $0x20] sm:$0xff]  ;;  %v28_v22 = vld [vmem:[%s449_s0 + $0x10] sm:$0xff]  ;;  %v27_v23 = vld [vmem:[%s449_s0 + $0x8] sm:$0xff] }
   0xd   :  { %227 = vmatpush.xpose.msk.msra.mxu2 %vm60_vm0, %v39_v3  ;;  %v26_v24 = vld [vmem:[%s449_s0] sm:$0xff]  ;;  %v24_v26 = vld [vmem:[%s450_s1 + $0x8] sm:$0xff]  ;;  %v25_v27 = vld [vmem:[%s450_s1 + $0x10] sm:$0xf]  ;;  %s286_s0 = smov [#allocation3]  }
   0xe   :  { %v23_v25 = vld [vmem:[%s450_s1] sm:$0xff]  ;;  %s192_s1 = sshll.u32 %s286_s0, 4  ;;  %s193_s1 = int_to_ptr.vmem [resolvable:$true] %s192_s1 }
  0x10   :  { %206 = vmatpush.xpose.msk.msra.mxu0 %vm60_vm0, %v38_v4  ;;  %228 = vmatpush.xpose.msk.msra.mxu1 %vm60_vm0, %v38_v4 }
  0x11   :  { %229 = vmatpush.xpose.msk.msra.mxu2 %vm60_vm0, %v38_v4  ;;  %52 = vperm.xlu0 %256, %v43_v12  }
  0x12   :  { %152 = vperm.xlu1 %257, %v147_v18  }
  0x13   :  { %162 = vperm.xlu2 %258, %v149_v19  }
  0x14   :  { %207 = vmatpush.xpose.msk.msra.mxu0 %vm60_vm0, %v37_v5  ;;  %230 = vmatpush.xpose.msk.msra.mxu1 %vm60_vm0, %v37_v5 }
  0x15   :  { %231 = vmatpush.xpose.msk.msra.mxu2 %vm60_vm0, %v37_v5 }
  0x18   :  { %208 = vmatpush.xpose.msk.msra.mxu0 %vm60_vm0, %v36_v6  ;;  %232 = vmatpush.xpose.msk.msra.mxu1 %vm60_vm0, %v36_v6 }
  0x19   :  { %233 = vmatpush.xpose.msk.msra.mxu2 %vm60_vm0, %v36_v6  ;;  %181 = vperm.xlu0 %256, %v178_v16  }
  0x1c   :  { %209 = vmatpush.xpose.msk.msra.mxu0 %vm60_vm0, %v35_v7  ;;  %234 = vmatpush.xpose.msk.msra.mxu1 %vm60_vm0, %v35_v7 }
  0x1d   :  { %235 = vmatpush.xpose.msk.msra.mxu2 %vm60_vm0, %v35_v7 }
  0x20   :  { %210 = vmatpush.xpose.msk.msra.mxu0 %vm60_vm0, %v34_v10  ;;  %236 = vmatpush.xpose.msk.msra.mxu1 %vm60_vm0, %v34_v10 }
  0x21   :  { %237 = vmatpush.xpose.msk.msra.mxu2 %vm60_vm0, %v34_v10 }
  0x24   :  { %211 = vmatpush.xpose.msk.msra.mxu0 %vm60_vm0, %v33_v11  ;;  %238 = vmatpush.xpose.msk.msra.mxu1 %vm60_vm0, %v33_v11 }
  0x25   :  { %239 = vmatpush.xpose.msk.msra.mxu2 %vm60_vm0, %v33_v11 }
  0x28   :  { %212 = vmatpush.xpose.msk.msra.mxu0 %vm60_vm0, %v32_v14  ;;  %240 = vmatpush.xpose.msk.msra.mxu1 %vm60_vm0, %v32_v14 }
  0x29   :  { %241 = vmatpush.xpose.msk.msra.mxu2 %vm60_vm0, %v32_v14 }
  0x2c   :  { %213 = vmatpush.xpose.msk.msra.mxu0 %vm60_vm0, %v31_v17  ;;  %242 = vmatpush.xpose.msk.msra.mxu1 %vm60_vm0, %v31_v17 }
  0x2d   :  { %243 = vmatpush.xpose.msk.msra.mxu2 %vm60_vm0, %v31_v17 }
  0x30   :  { %214 = vmatpush.xpose.msk.msra.mxu0 %vm60_vm0, %v30_v20  ;;  %244 = vmatpush.xpose.msk.msra.mxu1 %vm60_vm0, %v30_v20 }
  0x31   :  { %245 = vmatpush.xpose.msk.msra.mxu2 %vm60_vm0, %v30_v20 }
  0x34   :  { %215 = vmatpush.xpose.msk.msra.mxu0 %vm60_vm0, %v29_v21  ;;  %246 = vmatpush.xpose.msk.msra.mxu1 %vm60_vm0, %v29_v21 }
  0x35   :  { %247 = vmatpush.xpose.msk.msra.mxu2 %vm60_vm0, %v29_v21 }
  0x38   :  { %216 = vmatpush.xpose.msk.msra.mxu0 %vm60_vm0, %v28_v22  ;;  %248 = vmatpush.xpose.msk.msra.mxu1 %vm60_vm0, %v28_v22 }
  0x39   :  { %249 = vmatpush.xpose.msk.msra.mxu2 %vm60_vm0, %v28_v22 }
  0x3c   :  { %217 = vmatpush.xpose.msk.msra.mxu0 %vm60_vm0, %v27_v23  ;;  %250 = vmatpush.xpose.msk.msra.mxu1 %vm60_vm0, %v27_v23 }
  0x3d   :  { %251 = vmatpush.xpose.msk.msra.mxu2 %vm60_vm0, %v27_v23 }
  0x40   :  { %218 = vmatpush.xpose.msk.msra.mxu0 %vm60_vm0, %v26_v24  ;;  %252 = vmatpush.xpose.msk.msra.mxu1 %vm60_vm0, %v26_v24 }
  0x41   :  { %253 = vmatpush.xpose.msk.msra.mxu2 %vm60_vm0, %v26_v24 }
  0x43   :  { %219 = vmatmul.msk.f32.vlgmr.msra.gmra.mxu0 %vm60_vm0, %v23_v25  ;;  %220 = vmatmul.msk.f32.vlgmr.msra.gmra.mxu1 %vm60_vm0, %v24_v26 }
  0x44   :  { %221 = vmatmul.msk.f32.vlgmr.msra.gmra.mxu2 %vm60_vm0, %v25_v27 }
  0x65   :  { %v158_v33 = vpop.permute.xlu2 %157 }
  0x6d   :  { %v163_v44 = vpop.permute.xlu2 %162 }
  0x7b   :  { %v48_v28 = vpop.permute.xlu0 %47 }
  0x7c   :  { %v58_v29 = vpop.permute.xlu1 %57 }
  0x83   :  { %v53_v30 = vpop.permute.xlu0 %52 }
  0x84   :  { %v153_v39 = vpop.permute.xlu1 %152 }
  0x8b   :  { %v182_v53 = vpop.permute.xlu0 %181 }
  0x8c   :  { %v184_v55 = vperm.slane %v182_v53, 0 }
  0xc0   :  { %v135_v31 = vpop.f32.mrf.mxu0  ;;  %v138_v32 = vpop.f32.mrf.mxu1 }
  0xc1   :  { %v136_v34 = vadd.f32 %v135_v31, %v48_v28  ;;  %v139_v35 = vadd.f32 %v138_v32, %v53_v30 }
  0xc3   :  { %v144_v36 = vmax.f32 %v136_v34, 0.0  ;;  %v145_v37 = vmax.f32 %v139_v35, 0.0 }
  0xc5   :  { %v166_v41 = vmul.f32 %v158_v33, %v145_v37  ;;  %v165_v42 = vmul.f32 %v153_v39, %v144_v36 }
  0xc7   :  { %v141_v38 = vpop.f32.mrf.mxu2  ;;  %v168_v46 = vadd.f32 %v166_v41, %v165_v42 }
  0xc8   :  { %v142_v40 = vadd.f32 %v141_v38, %v58_v29 }
  0xca   :  { %v146_v43 = vmax.f32 %v142_v40, 0.0 }
  0xcc   :  { %v167_v45 = vmul.f32 %v163_v44, %v146_v43 }
  0xce   :  { %v170_v47 = vsel %vm169_vm1, %v167_v45, 0.0 }
  0xcf   :  { %v171_v48 = vadd.f32 %v170_v47, %v168_v46 }
  0xd1   :  { %v172_v49 = vrot.slane %v171_v48, 4 }
  0xd3   :  { %v173_v50 = vadd.f32 %v172_v49, %v171_v48 }
  0xd5   :  { %v174_v51 = vrot.slane %v173_v50, 2 }
  0xd7   :  { %v175_v52 = vadd.f32 %v174_v51, %v173_v50 }
  0xd9   :  { %v176_v54 = vrot.slane %v175_v52, 1 }
  0xdb   :  { %v177_v56 = vadd.f32 %v176_v54, %v175_v52 }
  0xdd   :  { %v185_v57 = vadd.f32 %v184_v55, %v177_v56 }
  0xdf   :  { %186 = vst [vmem:[#allocation3] sm:$0x1] %v185_v57 }
  0xe0   :  { %197 = dma.vmem_to_hbm [thread:$0]  %s193_s1, 16, %s195_s18, [#allocation4]  }
  0xe1   :  { %283 = dma.done.wait [#allocation4], 16  }
  0xe2   :  { %284 = vsyncadd [#allocation4], 4294967280 }
  0xe3   :  { %202 = vsyncpa [#allocation4], 1 }

</bundles_post_ra>
